<compile_context>
chip_gen: v7x
topology: tpu7x:2x2x1
jax: 0.10.0
libtpu: 0.0.40
codegen_flags: <defaults>
</compile_context>

<pallas_src>
import jax
import jax.numpy as jnp
from jax.experimental import pallas as pl
from jax.experimental.pallas import tpu as pltpu

EPS = 1e-5
_LANE = 128


def _prenorm_kernel(x_ref, w_ref, rowsum_ref, bias_ref, o_ref):
    # x_ref/o_ref: (C, THW) tile (channels on sublanes, spatial on lanes)
    # w_ref:       (C, C)  conv weight with g folded in (row = out channel), MXU dtype
    # rowsum_ref:  (C, 1)  f32 row-sums of the fused f32 weight
    # bias_ref:    (C, 1)  f32, W @ b + conv_b
    x = x_ref[...]

    # Channel statistics in f32 (one-pass mean / mean(x^2), clamped).
    xf = x.astype(jnp.float32)
    mean = jnp.mean(xf, axis=0, keepdims=True)                               # (1, THW)
    var = jnp.maximum(jnp.mean(xf * xf, axis=0, keepdims=True) - mean * mean, 0.0)
    d = jnp.sqrt(var) + EPS                   # PyTorch ChanNorm: sqrt(var) + eps
    r = pl.reciprocal(d, approx=True)         # EUP slot
    inv = r * (2.0 - d * r)                   # one Newton step -> ~f32 accuracy

    # 1x1 conv with mean subtraction folded in:
    #   W_s @ ((x - mean) * inv) == inv * (W_s @ x - rowsum * mean)
    # MXU reads x in its native/requested dtype with f32 accumulation.
    y = jnp.dot(w_ref[...], x.astype(w_ref.dtype),
                preferred_element_type=jnp.float32)                          # (C, THW)
    y = (y - rowsum_ref[...] * mean) * inv + bias_ref[...]
    o_ref[...] = y.astype(o_ref.dtype)


def _vmem_capacity_bytes():
    try:
        return int(pltpu.get_tpu_info().vmem_capacity_bytes)
    except Exception:
        return 64 * 1024 * 1024          # conservative fallback (v7x per-TC VMEM)


def _round_up(n, m):
    return (n + m - 1) // m * m


def _plan_tiles(c, hw_pad, in_itemsize, out_itemsize, mxu_itemsize):
    """Pick the spatial tile and the scoped-VMEM limit to hand to the compiler."""
    cap = _vmem_capacity_bytes()
    # 64-MiB-VMEM parts (v7x) hit ~85% of HBM roofline by 512-1024 lanes; 2048
    # buys nothing there while doubling the footprint.
    max_tile = 1024 if cap <= 64 * 1024 * 1024 else 2048
    budget = min(cap // 2, 32 * 1024 * 1024)

    # Grid-invariant weight/bias footprint (budget 2 weight copies: we do not rely
    # on single-buffering the constant-index operands).
    fixed = 2 * c * c * mxu_itemsize + 4 * c * 4

    # Bytes per spatial column: 2x double-buffered input + 2x double-buffered
    # output + f32 matmul result temp + f32 stats temp + MXU-dtype copy of x.
    per_col = c * (2 * in_itemsize + 2 * out_itemsize + 4 + 4 + mxu_itemsize)

    io_budget = max(budget - fixed, _LANE * per_col)
    t_cap = min(int(io_budget // max(per_col, 1)), max_tile)
    t_cap = max(t_cap - t_cap % _LANE, _LANE)

    if hw_pad <= t_cap:
        thw = hw_pad
    else:
        thw = _LANE                       # hw_pad is a multiple of 128, always divides
        t = t_cap
        while t >= _LANE:
            if hw_pad % t == 0:
                thw = t
                break
            t -= _LANE

    plan = per_col * thw + fixed
    vmem_limit = int(min(cap - 2 * 1024 * 1024, max(2 * plan, 32 * 1024 * 1024)))
    vmem_limit = max(vmem_limit, 16 * 1024 * 1024)
    return thw, vmem_limit


def prenorm_conv1x1(x_nchw, g, b, conv_w, conv_b, *, mxu_dtype=None):
    """Fused PreNorm(ChanNorm(dim), Conv2d(dim, dim, 1)) forward.

    x_nchw: (N, C, H, W);  g, b: (1, C, 1, 1);  conv_w: (C, C, 1, 1);  conv_b: (C,).
    mxu_dtype: dtype fed to the MXU.  Defaults to bf16 for bf16 inputs (bf16
    operands + f32 accumulation), f32 for f32 inputs.  Pass jnp.bfloat16 to force
    the fast bf16 matmul on f32 inputs when reduced precision is acceptable.
    """
    N, C, H, W = x_nchw.shape
    HW = H * W
    if mxu_dtype is None:
        mxu_dtype = jnp.bfloat16 if x_nchw.dtype == jnp.bfloat16 else jnp.float32
    mxu_dtype = jnp.dtype(mxu_dtype)

    x3 = x_nchw.reshape(N, C, HW)                # free reshape, no transpose

    # Fold ChanNorm affine params and the mean subtraction into the conv (algebra):
    #   W_s = W * g,  rowsum = W_s @ 1,  bias = W @ b + conv_b
    Wmat = conv_w.reshape(C, C).astype(jnp.float32)           # (out, in)
    g_vec = g.reshape(C).astype(jnp.float32)
    b_vec = b.reshape(C).astype(jnp.float32)
    w_scaled_f32 = Wmat * g_vec[None, :]                       # (C, C)
    rowsum = jnp.sum(w_scaled_f32, axis=1, keepdims=True)      # (C, 1)
    bias_fused = (Wmat @ b_vec + conv_b.astype(jnp.float32)).reshape(C, 1)
    w_scaled = w_scaled_f32.astype(mxu_dtype)

    # Pad HW up to a lane multiple so stores are unmasked vst (never vst.msk).
    HW_pad = _round_up(HW, _LANE)
    if HW_pad != HW:
        x3 = jnp.pad(x3, ((0, 0), (0, 0), (0, HW_pad - HW)))

    itemsize = jnp.dtype(x_nchw.dtype).itemsize
    thw, vmem_limit = _plan_tiles(C, HW_pad, itemsize, itemsize, mxu_dtype.itemsize)
    grid = (N, HW_pad // thw)

    # TODO(synk): for tiny C (<~16) a broadcasted-FMA VPU path would beat the
    # underfilled MXU; the kernel is HBM-bound there so the MXU path is kept.
    out3 = pl.pallas_call(
        _prenorm_kernel,
        out_shape=jax.ShapeDtypeStruct((N, C, HW_pad), x_nchw.dtype),
        grid_spec=pltpu.PrefetchScalarGridSpec(
            num_scalar_prefetch=0,
            grid=grid,
            in_specs=[
                pl.BlockSpec((None, C, thw), lambda n, j: (n, 0, j)),   # x tile (C, THW)
                pl.BlockSpec((C, C), lambda n, j: (0, 0)),              # fused weight
                pl.BlockSpec((C, 1), lambda n, j: (0, 0)),              # rowsum
                pl.BlockSpec((C, 1), lambda n, j: (0, 0)),              # fused bias
            ],
            out_specs=pl.BlockSpec((None, C, thw), lambda n, j: (n, 0, j)),
        ),
        compiler_params=pltpu.CompilerParams(
            dimension_semantics=("parallel", "parallel"),
            vmem_limit_bytes=vmem_limit,
        ),
    )(x3, w_scaled, rowsum, bias_fused)

    if HW_pad != HW:
        out3 = out3[..., :HW]
    return out3.reshape(N, C, H, W)


def _reference(x, g, b, conv_w, conv_b):
    # pure-JAX f32 reference of the PyTorch forward (ChanNorm then 1x1 conv)
    x = x.astype(jnp.float32)
    mean = jnp.mean(x, axis=1, keepdims=True)
    var = jnp.mean((x - mean) ** 2, axis=1, keepdims=True)
    xn = (x - mean) / (jnp.sqrt(var) + EPS) * g + b
    y = jnp.einsum("nchw,oc->nohw", xn,
                   conv_w.reshape(conv_w.shape[0], conv_w.shape[1]))
    return y + conv_b.reshape(1, -1, 1, 1)


if __name__ == "__main__":
    key = jax.random.PRNGKey(0)
    N, C, H, W = 2, 4, 16, 16

    k_x, k_w, k_b, k_g, k_cb = jax.random.split(key, 5)
    x = jax.random.normal(k_x, (N, C, H, W), dtype=jnp.float32)

    # ChanNorm params: init is ones/zeros; perturb slightly so the folding is exercised.
    g = jnp.ones((1, C, 1, 1), jnp.float32) \
        + 0.1 * jax.random.normal(k_g, (1, C, 1, 1), jnp.float32)
    b = 0.1 * jax.random.normal(k_cb, (1, C, 1, 1), jnp.float32)

    # fn = Conv2d(dim, dim, 1) with deterministic synthetic init
    conv_w = 0.1 * jax.random.normal(k_w, (C, C, 1, 1), dtype=jnp.float32)
    conv_b = 0.1 * jax.random.normal(k_b, (C,), dtype=jnp.float32)

    ref = _reference(x, g, b, conv_w, conv_b)

    # 1) f32 end-to-end (strict-parity path, f32 MXU).
    out = jax.block_until_ready(prenorm_conv1x1(x, g, b, conv_w, conv_b))
    assert out.shape == (N, C, H, W)
    err = float(jnp.max(jnp.abs(out - ref)))
    assert jnp.allclose(out, ref, atol=1e-4, rtol=1e-4), f"f32 path max err {err}"

    # 2) bf16 activations -> bf16 MXU operands + f32 accumulation (fast path).
    x_bf16 = x.astype(jnp.bfloat16)
    out_bf = jax.block_until_ready(prenorm_conv1x1(x_bf16, g, b, conv_w, conv_b))
    ref_bf = _reference(x_bf16, g, b, conv_w, conv_b)
    err_bf = float(jnp.max(jnp.abs(out_bf.astype(jnp.float32) - ref_bf)))
    assert err_bf < 2e-1, f"bf16 path max err {err_bf}"

    # 3) f32 activations with the bf16 MXU forced (review's big throughput lever).
    out_fast = jax.block_until_ready(
        prenorm_conv1x1(x, g, b, conv_w, conv_b, mxu_dtype=jnp.bfloat16))
    err_fast = float(jnp.max(jnp.abs(out_fast - ref)))
    assert err_fast < 2e-1, f"forced-bf16 path max err {err_fast}"

    print("KERNEL_OK")
</pallas_src>

<mosaic_0001>
module attributes {stable_mosaic.version = 11 : i64} {
  func.func @_prenorm_kernel(%arg0: i32, %arg1: i32, %arg2: memref<1x4x256xf32, #tpu.memory_space<vmem>>, %arg3: memref<4x4xf32, #tpu.memory_space<vmem>>, %arg4: memref<4x1xf32, #tpu.memory_space<vmem>>, %arg5: memref<4x1xf32, #tpu.memory_space<vmem>>, %arg6: memref<1x4x256xf32, #tpu.memory_space<vmem>>) attributes {dimension_semantics = [#tpu.dimension_semantics<parallel>, #tpu.dimension_semantics<parallel>], iteration_bounds = array<i64: 2, 1>, scalar_prefetch = 0 : i64, scratch_operands = 0 : i64, tpu.core_type = #tpu.core_type<tc>, window_params = [{transform_indices = @transform_0, window_bounds = array<i64: 1, 4, 256>}, {pipeline_mode = #tpu.pipeline_mode<synchronous>, transform_indices = @transform_1, window_bounds = array<i64: 4, 4>}, {pipeline_mode = #tpu.pipeline_mode<synchronous>, transform_indices = @transform_2, window_bounds = array<i64: 4, 1>}, {pipeline_mode = #tpu.pipeline_mode<synchronous>, transform_indices = @transform_3, window_bounds = array<i64: 4, 1>}, {transform_indices = @transform_4, window_bounds = array<i64: 1, 4, 256>}]} {
    %c0 = arith.constant 0 : index
    %c0_0 = arith.constant 0 : index
    %c0_1 = arith.constant 0 : index
    %0 = vector.load %arg2[%c0, %c0_0, %c0_1] : memref<1x4x256xf32, #tpu.memory_space<vmem>>, vector<1x4x256xf32>
    %1 = vector.shape_cast %0 : vector<1x4x256xf32> to vector<4x256xf32>
    %cst = arith.constant dense<0.000000e+00> : vector<256xf32>
    %2 = vector.multi_reduction <add>, %1, %cst [0] : vector<4x256xf32> to vector<256xf32>
    %3 = vector.shape_cast %2 : vector<256xf32> to vector<1x256xf32>
    %cst_2 = arith.constant 4.000000e+00 : f32
    %4 = vector.broadcast %cst_2 : f32 to vector<1x256xf32>
    %5 = arith.divf %3, %4 : vector<1x256xf32>
    %6 = arith.mulf %1, %1 : vector<4x256xf32>
    %cst_3 = arith.constant dense<0.000000e+00> : vector<256xf32>
    %7 = vector.multi_reduction <add>, %6, %cst_3 [0] : vector<4x256xf32> to vector<256xf32>
    %8 = vector.shape_cast %7 : vector<256xf32> to vector<1x256xf32>
    %cst_4 = arith.constant 4.000000e+00 : f32
    %9 = vector.broadcast %cst_4 : f32 to vector<1x256xf32>
    %10 = arith.divf %8, %9 : vector<1x256xf32>
    %11 = arith.mulf %5, %5 : vector<1x256xf32>
    %12 = arith.subf %10, %11 : vector<1x256xf32>
    %cst_5 = arith.constant 0.000000e+00 : f32
    %13 = vector.broadcast %cst_5 : f32 to vector<1x256xf32>
    %14 = arith.maximumf %12, %13 : vector<1x256xf32>
    %15 = math.sqrt %14 : vector<1x256xf32>
    %cst_6 = arith.constant 9.99999974E-6 : f32
    %16 = vector.broadcast %cst_6 : f32 to vector<1x256xf32>
    %17 = arith.addf %15, %16 : vector<1x256xf32>
    %18 = tpu.reciprocal %17 {approx = true} : vector<1x256xf32> -> vector<1x256xf32>
    %19 = arith.mulf %17, %18 : vector<1x256xf32>
    %cst_7 = arith.constant 2.000000e+00 : f32
    %20 = vector.broadcast %cst_7 : f32 to vector<1x256xf32>
    %21 = arith.subf %20, %19 : vector<1x256xf32>
    %22 = arith.mulf %18, %21 : vector<1x256xf32>
    %c0_8 = arith.constant 0 : index
    %c0_9 = arith.constant 0 : index
    %23 = vector.load %arg3[%c0_8, %c0_9] : memref<4x4xf32, #tpu.memory_space<vmem>>, vector<4x4xf32>
    %cst_10 = arith.constant dense<0.000000e+00> : vector<4x256xf32>
    %24 = tpu.matmul %23, %1, %cst_10 {dimension_numbers = #tpu.dot_dimension_numbers<[1], [0], [0], [1], [0, 0, 1, 1], [], []>} : vector<4x4xf32>, vector<4x256xf32>, vector<4x256xf32> -> vector<4x256xf32>
    %c0_11 = arith.constant 0 : index
    %c0_12 = arith.constant 0 : index
    %25 = vector.load %arg4[%c0_11, %c0_12] : memref<4x1xf32, #tpu.memory_space<vmem>>, vector<4x1xf32>
    %26 = vector.broadcast %25 : vector<4x1xf32> to vector<4x256xf32>
    %27 = vector.broadcast %5 : vector<1x256xf32> to vector<4x256xf32>
    %28 = arith.mulf %26, %27 : vector<4x256xf32>
    %29 = arith.subf %24, %28 : vector<4x256xf32>
    %30 = vector.broadcast %22 : vector<1x256xf32> to vector<4x256xf32>
    %31 = arith.mulf %29, %30 : vector<4x256xf32>
    %c0_13 = arith.constant 0 : index
    %c0_14 = arith.constant 0 : index
    %32 = vector.load %arg5[%c0_13, %c0_14] : memref<4x1xf32, #tpu.memory_space<vmem>>, vector<4x1xf32>
    %33 = vector.broadcast %32 : vector<4x1xf32> to vector<4x256xf32>
    %34 = arith.addf %31, %33 : vector<4x256xf32>
    %c0_15 = arith.constant 0 : index
    %c0_16 = arith.constant 0 : index
    %c0_17 = arith.constant 0 : index
    %35 = vector.load %arg6[%c0_15, %c0_16, %c0_17] : memref<1x4x256xf32, #tpu.memory_space<vmem>>, vector<1x4x256xf32>
    %36 = vector.shape_cast %35 : vector<1x4x256xf32> to vector<4x256xf32>
    %37 = vector.shape_cast %34 : vector<4x256xf32> to vector<1x4x256xf32>
    tpu.vector_store %arg6[%c0_15, %c0_16, %c0_17], %37 {strides = array<i32>} : memref<1x4x256xf32, #tpu.memory_space<vmem>>, vector<1x4x256xf32>,
    return
  }
  func.func @transform_0(%arg0: i32, %arg1: i32) -> (i32, i32, i32) {
    %c0_i32 = arith.constant 0 : i32
    %c0_i32_0 = arith.constant 0 : i32
    return %arg0, %c0_i32, %arg1 : i32, i32, i32
  }
  func.func @transform_1(%arg0: i32, %arg1: i32) -> (i32, i32) {
    %c0_i32 = arith.constant 0 : i32
    %c0_i32_0 = arith.constant 0 : i32
    %c0_i32_1 = arith.constant 0 : i32
    return %c0_i32, %c0_i32_0 : i32, i32
  }
  func.func @transform_2(%arg0: i32, %arg1: i32) -> (i32, i32) {
    %c0_i32 = arith.constant 0 : i32
    %c0_i32_0 = arith.constant 0 : i32
    %c0_i32_1 = arith.constant 0 : i32
    return %c0_i32, %c0_i32_0 : i32, i32
  }
  func.func @transform_3(%arg0: i32, %arg1: i32) -> (i32, i32) {
    %c0_i32 = arith.constant 0 : i32
    %c0_i32_0 = arith.constant 0 : i32
    %c0_i32_1 = arith.constant 0 : i32
    return %c0_i32, %c0_i32_0 : i32, i32
  }
  func.func @transform_4(%arg0: i32, %arg1: i32) -> (i32, i32, i32) {
    %c0_i32 = arith.constant 0 : i32
    %c0_i32_0 = arith.constant 0 : i32
    return %arg0, %c0_i32, %arg1 : i32, i32, i32
  }
}

</mosaic_0001>

<bundles_post_ra>
// kernel: tpu_custom_call.1
= control target key start
LH: loop header
LB: loop body
LE: loop exit
PB: predicated region body
PF: predicated region fallthrough
CT: control target
= control target key end

     0   :  { %9 = vsyncpa [#allocation3], 0  ;;  %s940_s0 = inlined_call_operand.hbm [shape: f32[2,4,256], index: 0, kind: input, shape index: {}]   ;;  %s941_s1 = inlined_call_operand.vmem [shape: f32[4,4], index: 1, kind: input, shape index: {}]   ;;  %s942_s2 = inlined_call_operand.vmem [shape: f32[4,1], index: 2, kind: input, shape index: {}]   ;;  %s943_s3 = inlined_call_operand.vmem [shape: f32[4,1], index: 3, kind: input, shape index: {}]   ;;  %s944_s4 = inlined_call_operand.hbm [shape: f32[2,4,256], index: 4, kind: output, shape index: {}]  }
   0x1   :  { %11 = vsyncpa [#allocation3 + $0x1], 0 }
   0x2   :  { %12 = vsyncpa [#allocation4], 0 }
   0x3   :  { %14 = vsyncpa [#allocation4 + $0x1], 0  ;;  %s749_s15 = smov 0   ;;  %s751_s16 = smov 0  }
   0x4   :  { %s753_s17 = smov 0   ;;  %s755_s18 = smov 0  }
   0x5   :  { %s757_s19 = smov 0   ;;  %s759_s20 = smov 0  }
   0x6 LB: > { %s512_s21 = sadd.s32 4294967295, %s718_s20   ;;  %s513_s22 = sadd.s32 4294967294, %s718_s20   ;;  %s718_s20 = sphi %s759_s20, %s20_s20   ;;  %s714_s19 = sphi %s757_s19, %s960_s19   ;;  %s710_s18 = sphi %s755_s18, %s959_s18   ;;  %s706_s17 = sphi %s753_s17, %s958_s17   ;;  %s702_s16 = sphi %s751_s16, %s957_s16   ;;  %s698_s15 = sphi %s749_s15, %s956_s15  }
   0x7   : > { %s32_s23 = sadd.s32 1, %s714_s19  ;;  %s41_s24 = sadd.s32 1, %s706_s17 }
   0x8   : > { %p34_p0 = scmp.ge.s32.totalorder %s32_s23, 2  ;;  %p48_p1 = scmp.ne.s32.totalorder %s706_s17, %s702_s16 }
   0x9   : > { %p49_p2 = scmp.eq.s32.totalorder %s718_s20, 0  ;;  %p54_p3 = scmp.ne.s32.totalorder %s702_s16, %s698_s15 }
   0xa   : > { %s962_s23 = smov (%p34_p0, %s32_s23), 0  ;;  %p55_p5 = scmp.eq.s32.totalorder %s512_s21, 0 }
   0xb   : > { %p790_p4 = por %p49_p2, %p48_p1  ;;  %s36_s26 = ssub.s32 %s714_s19, %s962_s23 }
   0xc   : > { %p143_p6 = scmp.eq.s32.totalorder %s512_s21, 1  ;;  %p39_p7 = scmp.eq.s32.totalorder %s36_s26, 0 }
   0xd   : > { %p796_p8 = por %p55_p5, %p54_p3  ;;  %p149_p10 = scmp.eq.s32.totalorder %s513_s22, 1 }
   0xe   : > { %p800_p9 = por %p143_p6, %p48_p1  ;;  %p544_p13 = scmp.lt.s32.totalorder %s718_s20, 2 }
   0xf   : > { %s805_s29 = scalar_select %p39_p7, %s706_s17, %s41_s24  }
  0x10   : > { %s948_s28 = scalar_select %p800_p9, 1, 0 }
  0x11   : > { %p807_p11 = por %p149_p10, %p54_p3  ;;  %s178_s5 = sand.u32 1, %s706_s17  }
  0x12   : > { %s516_s6 = sshll.u32 %s178_s5, 3  ;;  %s530_s7 = sshll.u32 %s714_s19, 7 }
  0x13   : > { %s949_s30 = scalar_select %p807_p11, 1, 0 }
  0x14   : > { %s818_s10 = scalar_lea.hbm %s940_s0, %s530_s7  ;;  %s182_s11 = scalar_lea.vmem [#allocation2], %s516_s6 }
  0x15   : > { %s192_s12 = sshll.u32 %s182_s11, 4  ;;  %p824_p0 = pnand %p544_p13, %p790_p4  ;;  %s820_s12 = int_to_ptr.vmem [resolvable:$true] %s192_s12 }
  0x16   : > { %s179_s14 = scalar_lea.sflag [#allocation3], %s178_s5  ;;  %s606_s21 = scalar_lea.hbm %s818_s10, 128 }
  0x17   : > { %p607_p3 = scmp.ne.s32.totalorder %s818_s10, %s606_s21  ;;  %p608_p5 = pneg %p824_p0 }
  0x18   : > { %s611_s25 = scalar_lea.hbm %s940_s0, 256  ;;  %p612_p4 = scmp.lt.u32.totalorder %s818_s10, %s940_s0 }
  0x19   : > { %p609_p6 = pnand %p608_p5, %p607_p3  ;;  %p613_p10 = scmp.lt.u32.totalorder %s611_s25, %s606_s21 }
  0x1a   : > { %p615_p12 = scmp.lt.u32.totalorder %s606_s21, %s818_s10 }
  0x1b   : > { %p610_p7 = pneg %p609_p6  ;;  %p614_p13 = por %p613_p10, %p612_p4 }
  0x1d   : > { %p616_p1 = por %p615_p12, %p614_p13 }
  0x1f   : > { %p617_p2 = pnand %p616_p1, %p610_p7 }
  0x21   : > { %620 = shalt.err (!%p617_p2)
}
  0x22   : > { %s621_s5 = scalar_lea.vmem %s820_s12, 128  ;;  %s720_s7 = smov [#allocation2]  }
  0x23   : > { %p622_p3 = scmp.ne.s32.totalorder %s820_s12, %s621_s5  ;;  %s626_s8 = sshll.u32 %s720_s7, 4  ;;  %s627_s8 = int_to_ptr.vmem [resolvable:$false] %s626_s8 }
  0x24   : > { %s628_s9 = scalar_lea.vmem %s627_s8, 256  ;;  %p629_p9 = scmp.lt.s32.totalorder %s820_s12, %s627_s8 }
  0x25   : > { %p624_p6 = pnand %p622_p3, %p608_p5  ;;  %p630_p4 = scmp.lt.s32.totalorder %s628_s9, %s621_s5 }
  0x27   : > { %p625_p11 = pneg %p624_p6  ;;  %p631_p10 = por %p630_p4, %p629_p9 }
  0x29   : > { %p632_p12 = pnand %p631_p10, %p625_p11 }
  0x2b   : > { %635 = shalt.err (!%p632_p12)
}
  0x2c   : > { %539 = dma.hbm_to_vmem [thread:$0]  (!%p824_p0), %s818_s10, 128, %s820_s12, %s179_s14  }
  0x2d   : > { %p951_p1 = scmp.lt.s32.totalorder %s718_s20, 3  ;;  %p952_p2 = scmp.ge.s32.totalorder %s718_s20, 1 }
  0x2f   : > { %p198_p5 = pnand %p952_p2, %p951_p1 }
  0x30   : > { %s860_s11 = sand.u32 (!%p198_p5), 1, %s702_s16  }
  0x31   : > { %201 = sbr.rel (%p198_p5) target bundleno = 297 (0x129), region = 36  ;;  %s520_s21 = sshll.u32 (!%p198_p5), %s860_s11, 3 }
  0x32   : > { %s204_s22 = scalar_lea.sflag (!%p198_p5), [#allocation3], %s860_s11  ;;  %s207_s13 = scalar_lea.vmem (!%p198_p5), [#allocation2], %s520_s21 }
  0x38   : > { %689 = dma.done.wait (%p796_p8), %s204_s22, 128  }
  0x39   : > { %691 = vsyncadd (%p796_p8), %s204_s22, 4294967168  ;;  %v721_v0 = vmov 0.0   ;;  %v722_v1 = vmov 0   ;;  %v234_v2 = vld [vmem:[%s207_s13] sm:$0xff]  ;;  %vm238_vm0 = vcmask 1043456   ;;  %vm307_vm1 = vcmask 31744  }
  0x3a   : > { %379 = vmatprep.mubr.f32.mxu0 %v721_v0  ;;  %596 = vset.pattern.permute.xlu0 %v722_v1  ;;  %v386_v3 = vld [vmem:[%s942_s2] sm:$0xf]  ;;  %v236_v4 = vcombine.high %v234_v2, %v234_v2  ;;  %v256_v5 = vmul.f32 %v234_v2, %v234_v2  ;;  %v239_v6 = vsel %vm238_vm0, %v234_v2, 0.0  ;;  %s531_s26 = sshll.u32 %s710_s18, 7  ;;  %s231_s6 = scalar_lea.vmem [#allocation5], %s520_s21 }
  0x3b   : > { %389 = vperm.xlu0 %596, %v386_v3   ;;  %v306_v7 = vld [vmem:[%s941_s1] sm:$0xf]  ;;  %v240_v9 = vrot.slane %v239_v6, 4  ;;  %s428_s5 = sshll.u32 %s231_s6, 4  ;;  %s891_s9 = scalar_lea.hbm %s944_s4, %s531_s26  ;;  %s893_s5 = int_to_ptr.vmem [resolvable:$true] %s428_s5 }
  0x3c   : > { %v398_v8 = vld [vmem:[%s943_s3] sm:$0xf]  ;;  %v246_v10 = vsel %vm238_vm0, %v236_v4, 0.0  ;;  %v258_v11 = vcombine.high %v256_v5, %v256_v5  ;;  %v260_v12 = vsel %vm238_vm0, %v256_v5, 0.0  ;;  %522 = vmatprep.subr.msk.mxu0 %vm238_vm0, %v236_v4  ;;  %s412_s22 = scalar_lea.sflag [#allocation4], %s860_s11  ;;  %s636_s13 = scalar_lea.vmem %s893_s5, 128 }
  0x3d   : > { %v247_v13 = vrot.slane %v246_v10, 4  ;;  %v261_v14 = vrot.slane %v260_v12, 4  ;;  %523 = vmatpush1.msk.msra.mxu0 %vm238_vm0, %v234_v2  ;;  %v241_v15 = vadd.f32 %v240_v9, %v239_v6  ;;  %p637_p8 = scmp.ne.s32.totalorder %s893_s5, %s636_s13  ;;  %p953_p9 = scmp.ne.s32.totalorder %s948_s28, 0 }
  0x3e   : > { %v267_v16 = vsel %vm238_vm0, %v258_v11, 0.0  ;;  %524 = vmatmul.mubr.msk.f32.vlgmr.msra.gmra.mrb[0].mxu0 %vm307_vm1, %v306_v7  ;;  %s723_s18 = smov [#allocation5]  }
  0x3f   : > { %401 = vperm.xlu0 %596, %v398_v8   ;;  %v248_v17 = vadd.f32 %v247_v13, %v246_v10  ;;  %v262_v18 = vadd.f32 %v261_v14, %v260_v12  ;;  %v268_v19 = vrot.slane %v267_v16, 4  ;;  %v242_v20 = vrot.slane %v241_v15, 2  ;;  %p638_p11 = pnand %p637_p8, %p953_p9  ;;  %s640_s21 = sshll.u32 %s723_s18, 4  ;;  %s641_s21 = int_to_ptr.vmem [resolvable:$false] %s640_s21 }
  0x40   : > { %s642_s10 = scalar_lea.vmem %s641_s21, 256  ;;  %p643_p7 = scmp.lt.s32.totalorder %s893_s5, %s641_s21 }
  0x41   : > { %v249_v21 = vrot.slane %v248_v17, 2  ;;  %v243_v22 = vadd.f32 %v242_v20, %v241_v15  ;;  %v263_v23 = vrot.slane %v262_v18, 2  ;;  %v269_v24 = vadd.f32 %v268_v19, %v267_v16  ;;  %p639_p0 = pneg %p638_p11  ;;  %p644_p13 = scmp.lt.s32.totalorder %s642_s10, %s636_s13 }
  0x43   : > { %v244_v25 = vrot.slane %v243_v22, 1  ;;  %v250_v26 = vadd.f32 %v249_v21, %v248_v17  ;;  %v264_v27 = vadd.f32 %v263_v23, %v262_v18  ;;  %v270_v28 = vrot.slane %v269_v24, 2  ;;  %p645_p3 = por %p644_p13, %p643_p7 }
  0x45   : > { %v245_v29 = vadd.f32 %v244_v25, %v243_v22  ;;  %v251_v30 = vrot.slane %v250_v26, 1  ;;  %v265_v31 = vrot.slane %v264_v27, 1  ;;  %v271_v32 = vadd.f32 %v270_v28, %v269_v24  ;;  %p646_p6 = pnand %p645_p3, %p639_p0 }
  0x47   : > { %v252_v33 = vadd.f32 %v251_v30, %v250_v26  ;;  %v254_v34 = vmul.f32 0.25, %v245_v29  ;;  %v266_v35 = vadd.f32 %v265_v31, %v264_v27  ;;  %v272_v36 = vrot.slane %v271_v32, 1 }
  0x49   : > { %v255_v37 = vmul.f32 0.25, %v252_v33  ;;  %v273_v38 = vadd.f32 %v272_v36, %v271_v32  ;;  %v274_v39 = vmul.f32 0.25, %v266_v35  ;;  %v276_v40 = vmul.f32 %v254_v34, %v254_v34 }
  0x4b   : > { %v275_v41 = vmul.f32 0.25, %v273_v38  ;;  %v277_v42 = vmul.f32 %v255_v37, %v255_v37  ;;  %v278_v43 = vsub.f32 %v274_v39, %v276_v40 }
  0x4d   : > { %v279_v44 = vsub.f32 %v275_v41, %v277_v42  ;;  %v280_v45 = vmax.f32 %v278_v43, 0.0 }
  0x4f   : > { %v281_v46 = vmax.f32 %v279_v44, 0.0  ;;  %598 = vrsqrt.f32 %v280_v45  ;;  %vm284_vm2 = vcmp.eq.f32.partialorder %v280_v45, inf  ;;  %v287_v51 = vand.u32 2147483648, %v280_v45 }
  0x50   : > { %vm286_vm4 = vcmp.eq.f32.partialorder %v280_v45, 0.0 }
  0x51   : > { %600 = vrsqrt.f32 %v281_v46  ;;  %vm291_vm3 = vcmp.eq.f32.partialorder %v281_v46, inf  ;;  %v294_v53 = vand.u32 2147483648, %v281_v46  ;;  %vm293_vm5 = vcmp.eq.f32.partialorder %v281_v46, 0.0 }
  0x59   : > { %v599_v47 = vpop.eup %598 }
  0x5a   : > { %v283_v49 = vmul.f32 %v599_v47, %v280_v45 }
  0x5b   : > { %v601_v48 = vpop.eup %600 }
  0x5c   : > { %v290_v50 = vmul.f32 %v601_v48, %v281_v46  ;;  %v285_v52 = vsel %vm284_vm2, %v280_v45, %v283_v49 }
  0x5d   : > { %v288_v55 = vsel %vm286_vm4, %v287_v51, %v285_v52 }
  0x5e   : > { %v292_v54 = vsel %vm291_vm3, %v281_v46, %v290_v50  ;;  %v296_v57 = vadd.f32 1e-05, %v288_v55 }
  0x5f   : > { %v295_v56 = vsel %vm293_vm5, %v294_v53, %v292_v54 }
  0x60   : > { %v297_v58 = vadd.f32 1e-05, %v295_v56  ;;  %602 = vrcp.f32 %v296_v57 }
  0x62   : > { %604 = vrcp.f32 %v297_v58 }
  0x6a   : > { %v603_v59 = vpop.eup %602 }
  0x6b   : > { %v300_v61 = vmul.f32 %v603_v59, %v296_v57 }
  0x6c   : > { %v605_v60 = vpop.eup %604 }
  0x6d   : > { %v301_v62 = vmul.f32 %v605_v60, %v297_v58  ;;  %v302_v63 = vsub.f32 2.0, %v300_v61 }
  0x6f   : > { %v303_v1 = vsub.f32 2.0, %v301_v62  ;;  %v304_v4 = vmul.f32 %v603_v59, %v302_v63 }
  0x71   : > { %v305_v6 = vmul.f32 %v605_v60, %v303_v1 }
  0xba   : > { %v390_v0 = vpop.permute.xlu0 %389 }
  0xbb   : > { %v392_v2 = vmul.f32 %v390_v0, %v254_v34  ;;  %v393_v3 = vmul.f32 %v390_v0, %v255_v37 }
  0xbe   : > { %v402_v11 = vpop.permute.xlu0 %401 }
 0x111   : > { %v381_v5 = vpop.f32.mrb[0].mxu0 }
 0x112   : > { %v394_v7 = vsub.f32 %v381_v5, %v392_v2  ;;  %v383_v8 = vpop.f32.mrb[1].mxu0 }
 0x113   : > { %v395_v9 = vsub.f32 %v383_v8, %v393_v3 }
 0x114   : > { %v396_v10 = vmul.f32 %v394_v7, %v304_v4 }
 0x115   : > { %v397_v12 = vmul.f32 %v395_v9, %v305_v6 }
 0x116   : > { %v404_v13 = vadd.f32 %v402_v11, %v396_v10 }
 0x117   : > { %v405_v14 = vadd.f32 %v402_v11, %v397_v12 }
 0x119   : > { %v408_v15 = vcombine.low %v404_v13, %v405_v14 }
 0x11b   : > { %410 = vst [vmem:[%s231_s6] sm:$0xff] %v408_v15 }
 0x11c   : > { %649 = shalt.err (!%p646_p6)
}
 0x11d   : > { %s650_s11 = scalar_lea.hbm %s891_s9, 128  ;;  %s654_s24 = scalar_lea.hbm %s944_s4, 256 }
 0x11e   : > { %p651_p4 = scmp.ne.s32.totalorder %s891_s9, %s650_s11  ;;  %p655_p1 = scmp.lt.u32.totalorder %s891_s9, %s944_s4 }
 0x11f   : > { %p656_p2 = scmp.lt.u32.totalorder %s654_s24, %s650_s11  ;;  %p658_p8 = scmp.lt.u32.totalorder %s650_s11, %s891_s9 }
 0x120   : > { %p652_p10 = pnand %p651_p4, %p953_p9 }
 0x121   : > { %p657_p5 = por %p656_p2, %p655_p1 }
 0x122   : > { %p653_p12 = pneg %p652_p10 }
 0x123   : > { %p659_p11 = por %p658_p8, %p657_p5 }
 0x125   : > { %p660_p0 = pnand %p659_p11, %p653_p12 }
 0x127   : > { %663 = shalt.err (!%p660_p0)
}
 0x128   : > { %534 = dma.vmem_to_hbm [thread:$0]  (%p953_p9), %s893_s5, 128, %s891_s9, %s412_s22  }
 0x129 PF: > { %s440_s26 = sand.u32 1, %s698_s15   ;;  %p954_p7 = scmp.ne.s32.totalorder %s949_s30, 0 }
 0x12a   : > { %p955_p13 = scmp.ge.s32.totalorder %s718_s20, 2  ;;  %s441_s6 = scalar_lea.sflag [#allocation4], %s440_s26 }
 0x12c   : > { %p541_p3 = pnand %p955_p13, %p954_p7 }
 0x12e   : > { %693 = dma.done.wait (!%p541_p3), %s441_s6, 128  }
 0x12f   : > { %695 = vsyncadd (!%p541_p3), %s441_s6, 4294967168  ;;  %s20_s20 = sadd.s32 1, %s718_s20   ;;  %s956_s15 = smov %s702_s16 }
 0x130   : > { %p17_p6 = scmp.ge.s32.totalorder %s20_s20, 4   ;;  %s957_s16 = smov %s706_s17 }
 0x131   : > { %s958_s17 = smov %s805_s29  ;;  %s959_s18 = smov %s714_s19 }
 0x132   : > { %s960_s19 = smov %s962_s23  ;;  %19 = sbr.rel (!%p17_p6) target bundleno = 6 (0x6), region = 81 }
 0x139   :  { %446 = vsyncpa [#allocation3], 1 }
 0x13a   :  { %448 = vsyncpa [#allocation3 + $0x1], 1 }
 0x13b   :  { %449 = vsyncpa [#allocation4], 1 }
 0x13c   :  { %451 = vsyncpa [#allocation4 + $0x1], 1 }

</bundles_post_ra>
